<compile_context>
chip_gen: v7x
topology: tpu7x:2x2x1
jax: 0.10.0
libtpu: 0.0.40
codegen_flags: <defaults>
</compile_context>

<pallas_src>
import functools

import jax
import jax.numpy as jnp
from jax.experimental import pallas as pl
from jax.experimental.pallas import tpu as pltpu


def pcb_head_kernel(x_ref, w_ref, b_ref, fcw_ref, feat_bn_ref, logits_ref,
                    acc_ref, *, inv_spatial):
    # x_ref       : (N, tS, C_in)          one spatial chunk of one stripe (bf16 or f32)
    # w_ref       : (1, C_in, C_local)     BN-folded 1x1-conv weight (pre-transposed)
    # b_ref       : (1, 1, C_local)        BN-folded bias
    # fcw_ref     : (1, C_local, n_cls)    classifier weight (pre-transposed)
    # feat_bn_ref : (1, N, C_local)
    # logits_ref  : (1, N, n_cls)
    # acc_ref     : (N, C_in) f32 scratch  running spatial sum for the current stripe
    k = pl.program_id(1)

    @pl.when(k == 0)
    def _():
        acc_ref[...] = jnp.zeros_like(acc_ref)

    # Accumulate the spatial sum in f32 (input may be bf16 on the HBM->VMEM path).
    x = x_ref[...].astype(jnp.float32)                      # (N, tS, C_in)
    acc_ref[...] += jnp.sum(x, axis=1)                      # (N, C_in)

    @pl.when(k == pl.num_programs(1) - 1)
    def _():
        # AdaptiveAvgPool2d(1) over the full stripe (divisor = full stripe size S).
        pooled = acc_ref[...] * inv_spatial                 # (N, C_in)
        # 1x1 conv + BN (eval), folded into a single affine; conv & avg-pool commute.
        feat_bn = jnp.dot(pooled, w_ref[0],
                          preferred_element_type=jnp.float32) + b_ref[0]  # (N, C_local)
        feat_bn_ref[0] = feat_bn.astype(feat_bn_ref.dtype)
        # Classifier: Linear(C_local -> num_classes, bias=False).
        logits_ref[0] = jnp.dot(feat_bn, fcw_ref[0],
                                preferred_element_type=jnp.float32
                                ).astype(logits_ref.dtype)


def _choose_chunk(S, N, C_in, itemsize, target_bytes=4 << 20):
    """Largest multiple-of-8 divisor of S whose x block fits ~target_bytes."""
    if S % 8 != 0:
        return S  # odd stripe size: fall back to the full stripe per step
    cands = [d for d in range(8, S + 1, 8) if S % d == 0]
    fitting = [d for d in cands if N * d * C_in * itemsize <= target_bytes]
    return max(fitting) if fitting else min(cands)


def pcb_head(feat_nhwc, conv_w, conv_b, bn_gamma, bn_beta, bn_mean, bn_var,
             fc_w, *, num_stripes=6, eps=1e-5, ts=None):
    """PCB head on a backbone feature map in NHWC layout.

    feat_nhwc : (N, H, W, C_in) with H % num_stripes == 0. bf16 recommended.
    conv_w    : (num_stripes, C_local, C_in)      (torch Conv2d 1x1 layout, squeezed)
    conv_b    : (num_stripes, C_local)
    bn_*      : (num_stripes, C_local)            BatchNorm1d eval-mode params/stats
    fc_w      : (num_stripes, num_classes, C_local)

    Returns (feat_bn, logits):
      feat_bn : (num_stripes, N, C_local)   -- eval-mode forward output (as a list in torch)
      logits  : (num_stripes, N, num_classes)
    """
    N, H, W, C_in = feat_nhwc.shape
    assert H % num_stripes == 0
    stripe_h = H // num_stripes
    S = stripe_h * W                                   # spatial extent of one stripe
    C_local = conv_w.shape[1]
    num_classes = fc_w.shape[1]

    # Free reshape (no data movement): (N, H, W, C) -> (N, H*W, C); stripe i occupies
    # rows [i*S, (i+1)*S) of axis 1. All stripe/chunk selection happens in index_map.
    x = feat_nhwc.reshape(N, num_stripes * S, C_in)

    itemsize = jnp.dtype(x.dtype).itemsize
    if ts is None:
        ts = _choose_chunk(S, N, C_in, itemsize)
    assert S % ts == 0
    n_chunks = S // ts

    # Fold BN (eval) + conv bias into the 1x1-conv weight/bias; pre-transpose weights
    # so the kernel contracts lanes directly (no in-kernel `.T`). Tiny host-side work.
    f32 = jnp.float32
    inv_std = 1.0 / jnp.sqrt(bn_var.astype(f32) + eps)               # (ns, C_local)
    bn_scale = bn_gamma.astype(f32) * inv_std
    bn_bias = bn_beta.astype(f32) - bn_mean.astype(f32) * bn_scale
    w_folded = jnp.transpose(conv_w.astype(f32), (0, 2, 1)) * bn_scale[:, None, :]
    b_folded = (conv_b.astype(f32) * bn_scale + bn_bias)[:, None, :]  # (ns, 1, C_local)
    fcw_t = jnp.transpose(fc_w.astype(f32), (0, 2, 1))                # (ns, C_local, n_cls)

    kernel = functools.partial(pcb_head_kernel, inv_spatial=float(1.0 / S))

    out_shape = (
        jax.ShapeDtypeStruct((num_stripes, N, C_local), jnp.float32),
        jax.ShapeDtypeStruct((num_stripes, N, num_classes), jnp.float32),
    )
    feat_bn, logits = pl.pallas_call(
        kernel,
        out_shape=out_shape,
        grid_spec=pltpu.PrefetchScalarGridSpec(
            num_scalar_prefetch=0,
            grid=(num_stripes, n_chunks),
            in_specs=[
                # One spatial chunk of one stripe: block index along axis 1.
                pl.BlockSpec((N, ts, C_in), lambda i, k: (0, i * n_chunks + k, 0)),
                pl.BlockSpec((1, C_in, C_local), lambda i, k: (i, 0, 0)),
                pl.BlockSpec((1, 1, C_local), lambda i, k: (i, 0, 0)),
                pl.BlockSpec((1, C_local, num_classes), lambda i, k: (i, 0, 0)),
            ],
            out_specs=[
                pl.BlockSpec((1, N, C_local), lambda i, k: (i, 0, 0)),
                pl.BlockSpec((1, N, num_classes), lambda i, k: (i, 0, 0)),
            ],
            scratch_shapes=[pltpu.VMEM((N, C_in), jnp.float32)],
        ),
        compiler_params=pltpu.CompilerParams(
            dimension_semantics=("parallel", "arbitrary"),
            # Explicit budget: safe on v5e/v6e (128 MiB) and v7x (64 MiB physical),
            # comfortably above the double-buffered working set at production sizes.
            vmem_limit_bytes=32 * 1024 * 1024,
        ),
    )(x, w_folded, b_folded, fcw_t)
    return feat_bn, logits


def pcb_head_nchw(feat_nchw, *args, **kwargs):
    """Compat shim for torch-style NCHW backbones (single transpose; prefer NHWC)."""
    return pcb_head(jnp.transpose(feat_nchw, (0, 2, 3, 1)), *args, **kwargs)


def reference_head(feat_nhwc, conv_w, conv_b, bn_gamma, bn_beta, bn_mean, bn_var,
                   fc_w, *, num_stripes=6, eps=1e-5):
    """Pure-JAX reference mirroring the PyTorch eval forward (f32 compute)."""
    x = feat_nhwc.astype(jnp.float32)
    N, H, W, C_in = x.shape
    stripe_h = H // num_stripes
    feats, logits = [], []
    for i in range(num_stripes):
        s = x[:, i * stripe_h:(i + 1) * stripe_h, :, :]              # (N,h,W,C_in)
        pooled = jnp.mean(s, axis=(1, 2))                            # (N,C_in)
        f = pooled @ conv_w[i].T + conv_b[i]                         # (N,C_local)
        f_bn = (f - bn_mean[i]) / jnp.sqrt(bn_var[i] + eps) * bn_gamma[i] + bn_beta[i]
        feats.append(f_bn)
        logits.append(f_bn @ fc_w[i].T)
    return jnp.stack(feats), jnp.stack(logits)


if __name__ == "__main__":
    # Small stand-in sizes (PyTorch uses in_planes=2048, local_conv_channel=256).
    num_stripes = 6
    N, C_in, H, W = 2, 64, 12, 8          # H divisible by num_stripes; S = 2*8 = 16
    C_local, num_classes = 32, 16

    key = jax.random.PRNGKey(0)
    k_feat, k_cw, k_fc = jax.random.split(key, 3)

    # Backbone feature map in NHWC; cast to bf16 for the HBM->VMEM path.
    feat = jax.random.normal(k_feat, (N, H, W, C_in), jnp.float32).astype(jnp.bfloat16)

    # Per-stripe parameters (deterministic init mirroring __init__'s semantics):
    conv_w = 0.05 * jax.random.normal(k_cw, (num_stripes, C_local, C_in), jnp.float32)
    conv_b = jnp.zeros((num_stripes, C_local), jnp.float32)
    bn_gamma = jnp.ones((num_stripes, C_local), jnp.float32)
    bn_beta = jnp.zeros((num_stripes, C_local), jnp.float32)
    bn_mean = jnp.zeros((num_stripes, C_local), jnp.float32)
    bn_var = jnp.ones((num_stripes, C_local), jnp.float32)
    fc_w = 0.001 * jax.random.normal(k_fc, (num_stripes, num_classes, C_local), jnp.float32)

    # ts=8 exercises the multi-chunk spatial-reduction path (S=16 -> 2 chunks).
    feat_bn, logits = pcb_head(feat, conv_w, conv_b, bn_gamma, bn_beta,
                               bn_mean, bn_var, fc_w,
                               num_stripes=num_stripes, ts=8)
    jax.block_until_ready((feat_bn, logits))

    ref_feat_bn, ref_logits = reference_head(feat, conv_w, conv_b, bn_gamma, bn_beta,
                                             bn_mean, bn_var, fc_w,
                                             num_stripes=num_stripes)
    assert jnp.allclose(feat_bn, ref_feat_bn, atol=1e-4, rtol=1e-4)
    assert jnp.allclose(logits, ref_logits, atol=1e-5, rtol=1e-4)

    print("KERNEL_OK")
</pallas_src>

<mosaic_0001>
module attributes {stable_mosaic.version = 11 : i64} {
  func.func @pcb_head_kernel(%arg0: i32, %arg1: i32, %arg2: memref<2x8x64xbf16, #tpu.memory_space<vmem>>, %arg3: memref<1x64x32xf32, #tpu.memory_space<vmem>>, %arg4: memref<1x1x32xf32, #tpu.memory_space<vmem>>, %arg5: memref<1x32x16xf32, #tpu.memory_space<vmem>>, %arg6: memref<1x2x32xf32, #tpu.memory_space<vmem>>, %arg7: memref<1x2x16xf32, #tpu.memory_space<vmem>>, %arg8: memref<2x64xf32, #tpu.memory_space<vmem>>) attributes {dimension_semantics = [#tpu.dimension_semantics<parallel>, #tpu.dimension_semantics<arbitrary>], iteration_bounds = array<i64: 6, 2>, scalar_prefetch = 0 : i64, scratch_operands = 1 : i64, tpu.core_type = #tpu.core_type<tc>, window_params = [{transform_indices = @transform_0, window_bounds = array<i64: 2, 8, 64>}, {transform_indices = @transform_1, window_bounds = array<i64: 1, 64, 32>}, {transform_indices = @transform_2, window_bounds = array<i64: 1, 1, 32>}, {transform_indices = @transform_3, window_bounds = array<i64: 1, 32, 16>}, {transform_indices = @transform_4, window_bounds = array<i64: 1, 2, 32>}, {transform_indices = @transform_5, window_bounds = array<i64: 1, 2, 16>}]} {
    %c0_i32 = arith.constant 0 : i32
    %0 = arith.cmpi eq, %arg1, %c0_i32 : i32
    %1 = arith.extui %0 : i1 to i32
    %c0_i32_0 = arith.constant 0 : i32
    %2 = arith.cmpi ne, %1, %c0_i32_0 : i32
    scf.if %2 {
      %cst_8 = arith.constant 0.000000e+00 : f32
      %12 = vector.broadcast %cst_8 : f32 to vector<2x64xf32>
      %c0_9 = arith.constant 0 : index
      %c0_10 = arith.constant 0 : index
      %13 = vector.load %arg8[%c0_9, %c0_10] : memref<2x64xf32, #tpu.memory_space<vmem>>, vector<2x64xf32>
      tpu.vector_store %arg8[%c0_9, %c0_10], %12 {strides = array<i32>} : memref<2x64xf32, #tpu.memory_space<vmem>>, vector<2x64xf32>,
    } else {
    }
    %c0 = arith.constant 0 : index
    %c0_1 = arith.constant 0 : index
    %c0_2 = arith.constant 0 : index
    %3 = vector.load %arg2[%c0, %c0_1, %c0_2] : memref<2x8x64xbf16, #tpu.memory_space<vmem>>, vector<2x8x64xbf16>
    %4 = arith.extf %3 : vector<2x8x64xbf16> to vector<2x8x64xf32>
    %c0_3 = arith.constant 0 : index
    %c0_4 = arith.constant 0 : index
    %5 = vector.load %arg8[%c0_3, %c0_4] : memref<2x64xf32, #tpu.memory_space<vmem>>, vector<2x64xf32>
    %cst = arith.constant dense<0.000000e+00> : vector<2x64xf32>
    %6 = vector.multi_reduction <add>, %4, %cst [1] : vector<2x8x64xf32> to vector<2x64xf32>
    %7 = arith.addf %5, %6 : vector<2x64xf32>
    %c0_5 = arith.constant 0 : index
    %c0_6 = arith.constant 0 : index
    %8 = vector.load %arg8[%c0_5, %c0_6] : memref<2x64xf32, #tpu.memory_space<vmem>>, vector<2x64xf32>
    tpu.vector_store %arg8[%c0_5, %c0_6], %7 {strides = array<i32>} : memref<2x64xf32, #tpu.memory_space<vmem>>, vector<2x64xf32>,
    %c1_i32 = arith.constant 1 : i32
    %9 = arith.cmpi eq, %arg1, %c1_i32 : i32
    %10 = arith.extui %9 : i1 to i32
    %c0_i32_7 = arith.constant 0 : i32
    %11 = arith.cmpi ne, %10, %c0_i32_7 : i32
    scf.if %11 {
      %c0_8 = arith.constant 0 : index
      %c0_9 = arith.constant 0 : index
      %12 = vector.load %arg8[%c0_8, %c0_9] : memref<2x64xf32, #tpu.memory_space<vmem>>, vector<2x64xf32>
      %cst_10 = arith.constant 6.250000e-02 : f32
      %13 = vector.broadcast %cst_10 : f32 to vector<2x64xf32>
      %14 = arith.mulf %12, %13 : vector<2x64xf32>
      %c0_11 = arith.constant 0 : index
      %c0_12 = arith.constant 0 : index
      %c0_13 = arith.constant 0 : index
      %15 = vector.load %arg3[%c0_11, %c0_12, %c0_13] : memref<1x64x32xf32, #tpu.memory_space<vmem>>, vector<1x64x32xf32>
      %16 = vector.shape_cast %15 : vector<1x64x32xf32> to vector<64x32xf32>
      %cst_14 = arith.constant dense<0.000000e+00> : vector<2x32xf32>
      %17 = tpu.matmul %14, %16, %cst_14 {dimension_numbers = #tpu.dot_dimension_numbers<[1], [0], [0], [1], [0, 0, 1, 1], [], []>} : vector<2x64xf32>, vector<64x32xf32>, vector<2x32xf32> -> vector<2x32xf32>
      %c0_15 = arith.constant 0 : index
      %c0_16 = arith.constant 0 : index
      %c0_17 = arith.constant 0 : index
      %18 = vector.load %arg4[%c0_15, %c0_16, %c0_17] : memref<1x1x32xf32, #tpu.memory_space<vmem>>, vector<1x1x32xf32>
      %19 = vector.shape_cast %18 : vector<1x1x32xf32> to vector<1x32xf32>
      %20 = vector.broadcast %19 : vector<1x32xf32> to vector<2x32xf32>
      %21 = arith.addf %17, %20 : vector<2x32xf32>
      %c0_18 = arith.constant 0 : index
      %c0_19 = arith.constant 0 : index
      %c0_20 = arith.constant 0 : index
      %22 = vector.load %arg6[%c0_18, %c0_19, %c0_20] : memref<1x2x32xf32, #tpu.memory_space<vmem>>, vector<1x2x32xf32>
      %23 = vector.shape_cast %22 : vector<1x2x32xf32> to vector<2x32xf32>
      %24 = vector.shape_cast %21 : vector<2x32xf32> to vector<1x2x32xf32>
      tpu.vector_store %arg6[%c0_18, %c0_19, %c0_20], %24 {strides = array<i32>} : memref<1x2x32xf32, #tpu.memory_space<vmem>>, vector<1x2x32xf32>,
      %c0_21 = arith.constant 0 : index
      %c0_22 = arith.constant 0 : index
      %c0_23 = arith.constant 0 : index
      %25 = vector.load %arg5[%c0_21, %c0_22, %c0_23] : memref<1x32x16xf32, #tpu.memory_space<vmem>>, vector<1x32x16xf32>
      %26 = vector.shape_cast %25 : vector<1x32x16xf32> to vector<32x16xf32>
      %cst_24 = arith.constant dense<0.000000e+00> : vector<2x16xf32>
      %27 = tpu.matmul %21, %26, %cst_24 {dimension_numbers = #tpu.dot_dimension_numbers<[1], [0], [0], [1], [0, 0, 1, 1], [], []>} : vector<2x32xf32>, vector<32x16xf32>, vector<2x16xf32> -> vector<2x16xf32>
      %c0_25 = arith.constant 0 : index
      %c0_26 = arith.constant 0 : index
      %c0_27 = arith.constant 0 : index
      %28 = vector.load %arg7[%c0_25, %c0_26, %c0_27] : memref<1x2x16xf32, #tpu.memory_space<vmem>>, vector<1x2x16xf32>
      %29 = vector.shape_cast %28 : vector<1x2x16xf32> to vector<2x16xf32>
      %30 = vector.shape_cast %27 : vector<2x16xf32> to vector<1x2x16xf32>
      tpu.vector_store %arg7[%c0_25, %c0_26, %c0_27], %30 {strides = array<i32>} : memref<1x2x16xf32, #tpu.memory_space<vmem>>, vector<1x2x16xf32>,
    } else {
    }
    return
  }
  func.func @transform_0(%arg0: i32, %arg1: i32) -> (i32, i32, i32) {
    %c2_i32 = arith.constant 2 : i32
    %0 = arith.muli %arg0, %c2_i32 : i32
    %1 = arith.addi %0, %arg1 : i32
    %c0_i32 = arith.constant 0 : i32
    %c0_i32_0 = arith.constant 0 : i32
    %c0_i32_1 = arith.constant 0 : i32
    return %c0_i32, %1, %c0_i32_0 : i32, i32, i32
  }
  func.func @transform_1(%arg0: i32, %arg1: i32) -> (i32, i32, i32) {
    %c0_i32 = arith.constant 0 : i32
    %c0_i32_0 = arith.constant 0 : i32
    %c0_i32_1 = arith.constant 0 : i32
    return %arg0, %c0_i32, %c0_i32_0 : i32, i32, i32
  }
  func.func @transform_2(%arg0: i32, %arg1: i32) -> (i32, i32, i32) {
    %c0_i32 = arith.constant 0 : i32
    %c0_i32_0 = arith.constant 0 : i32
    %c0_i32_1 = arith.constant 0 : i32
    return %arg0, %c0_i32, %c0_i32_0 : i32, i32, i32
  }
  func.func @transform_3(%arg0: i32, %arg1: i32) -> (i32, i32, i32) {
    %c0_i32 = arith.constant 0 : i32
    %c0_i32_0 = arith.constant 0 : i32
    %c0_i32_1 = arith.constant 0 : i32
    return %arg0, %c0_i32, %c0_i32_0 : i32, i32, i32
  }
  func.func @transform_4(%arg0: i32, %arg1: i32) -> (i32, i32, i32) {
    %c0_i32 = arith.constant 0 : i32
    %c0_i32_0 = arith.constant 0 : i32
    %c0_i32_1 = arith.constant 0 : i32
    return %arg0, %c0_i32, %c0_i32_0 : i32, i32, i32
  }
  func.func @transform_5(%arg0: i32, %arg1: i32) -> (i32, i32, i32) {
    %c0_i32 = arith.constant 0 : i32
    %c0_i32_0 = arith.constant 0 : i32
    %c0_i32_1 = arith.constant 0 : i32
    return %arg0, %c0_i32, %c0_i32_0 : i32, i32, i32
  }
}

</mosaic_0001>

<bundles_post_ra>
// kernel: tpu_custom_call.1
= control target key start
LH: loop header
LB: loop body
LE: loop exit
PB: predicated region body
PF: predicated region fallthrough
CT: control target
= control target key end

     0   :  { %s1355_s0 = inlined_call_operand.vmem [shape: bf16[2,96,64], index: 0, kind: input, shape index: {}]   ;;  %s1356_s1 = inlined_call_operand.vmem [shape: f32[6,64,32], index: 1, kind: input, shape index: {}]   ;;  %s1357_s2 = inlined_call_operand.vmem [shape: f32[6,1,32], index: 2, kind: input, shape index: {}]   ;;  %s1358_s3 = inlined_call_operand.vmem [shape: f32[6,32,16], index: 3, kind: input, shape index: {}]   ;;  %s1359_s4 = inlined_call_operand.hbm [shape: f32[6,2,32], index: 4, kind: output, shape index: {0}]   ;;  %s1360_s5 = inlined_call_operand.hbm [shape: f32[6,2,16], index: 5, kind: output, shape index: {1}]  }
   0x1   :  { %1366 = sst [smem:[#allocation17_spill]] %s1355_s0 }
   0x2   :  { %11 = vsyncpa [#allocation5], 0 }
   0x3   :  { %13 = vsyncpa [#allocation5 + $0x1], 0 }
   0x4   :  { %14 = vsyncpa [#allocation7], 0 }
   0x5   :  { %16 = vsyncpa [#allocation7 + $0x1], 0  ;;  %s1110_s18 = smov 0   ;;  %s1112_s19 = smov 0  }
   0x6   :  { %s1114_s20 = smov 0   ;;  %s1116_s21 = smov 0  }
   0x7   :  { %s1118_s22 = smov 0   ;;  %s1120_s23 = smov 0  }
   0x8   :  { %s1122_s24 = smov 0   ;;  %s1124_s25 = smov 0  }
   0x9   :  { %s1126_s26 = smov 0   ;;  %s1128_s27 = smov 0  }
   0xa LB: > { %1367 = sst [smem:[#allocation10_spill]] %s1052_s22  ;;  %s738_s28 = sadd.s32 4294967295, %s1072_s27   ;;  %s1072_s27 = sphi %s1128_s27, %s22_s27   ;;  %s1068_s26 = sphi %s1126_s26, %s1384_s26   ;;  %s1064_s25 = sphi %s1124_s25, %s1383_s25   ;;  %s1060_s24 = sphi %s1122_s24, %s1382_s24   ;;  %s1056_s23 = sphi %s1120_s23, %s1381_s23   ;;  %s1052_s22 = sphi %s1118_s22, %s1380_s22   ;;  %s1048_s21 = sphi %s1116_s21, %s1379_s21   ;;  %s1044_s20 = sphi %s1114_s20, %s1387_s20   ;;  %s1040_s19 = sphi %s1112_s19, %s1386_s19   ;;  %s1036_s18 = sphi %s1110_s18, %s1385_s18  }
   0xb   : > { %1368 = sst [smem:[#allocation11_spill]] %s1064_s25  ;;  %s739_s29 = sadd.s32 4294967294, %s1072_s27  }
   0xc   : > { %1369 = sst [smem:[#allocation12_spill]] %s1068_s26  ;;  %s31_s30 = sadd.s32 1, %s1064_s25 }
   0xd   : > { %s34_s6 = sadd.s32 1, %s1068_s26  ;;  %p32_p0 = scmp.ge.s32.totalorder %s31_s30, 2 }
   0xe   : > { %s740_s7 = sshll.u32 %s1068_s26, 1  ;;  %s45_s9 = sadd.s32 1, %s1052_s22 }
   0xf   : > { %s1166_s8 = sadd.s32 %s1064_s25, %s740_s7  ;;  %s1389_s30 = smov (%p32_p0, %s31_s30), 0 }
  0x10   : > { %1370 = sst [smem:[#allocation13_spill]] %s1389_s30  ;;  %s1391_s6 = smov (!%p32_p0, %s34_s6), %s1068_s26 }
  0x11   : > { %p52_p1 = scmp.ne.s32.totalorder %s1052_s22, %s1048_s21  ;;  %p53_p2 = scmp.eq.s32.totalorder %s1072_s27, 0 }
  0x12   : > { %p36_p3 = scmp.ge.s32.totalorder %s1391_s6, 6  ;;  %s149_s10 = sadd.s32 1, %s1044_s20 }
  0x13   : > { %p1176_p4 = por %p53_p2, %p52_p1  ;;  %p159_p5 = scmp.ne.s32.totalorder %s1044_s20, %s1040_s19 }
  0x14   : > { %s1393_s6 = smov (%p36_p3, %s1391_s6), 0  ;;  %p160_p6 = scmp.eq.s32.totalorder %s738_s28, 11 }
  0x15   : > { %1372 = sst [smem:[#allocation14_spill]] %s1393_s6  ;;  %p165_p7 = scmp.ne.s32.totalorder %s1040_s19, %s1036_s18 }
  0x16   : > { %s741_s12 = sshll.u32 %s1393_s6, 1  ;;  %s146_s13 = ssub.s32 %s1068_s26, %s1393_s6 }
  0x17   : > { %s41_s14 = sadd.s32 %s741_s12, %s1389_s30  ;;  %p147_p8 = scmp.eq.s32.totalorder %s146_s13, 0 }
  0x18   : > { %s42_s15 = ssub.s32 %s1166_s8, %s41_s14  ;;  %p1191_p9 = por %p160_p6, %p159_p5 }
  0x19   : > { %p43_p10 = scmp.eq.s32.totalorder %s42_s15, 0  ;;  %p166_p11 = scmp.eq.s32.totalorder %s739_s29, 11 }
  0x1a   : > { %s1196_s17 = scalar_select %p147_p8, %s1044_s20, %s149_s10  }
  0x1b   : > { %s1199_s7 = scalar_select %p43_p10, %s1052_s22, %s45_s9  }
  0x1c   : > { %1374 = sst [smem:[#allocation15_spill]] %s1196_s17  ;;  %p1201_p12 = por %p166_p11, %p165_p7 }
  0x1d   : > { %1375 = sst [smem:[#allocation16_spill]] %s1199_s7  ;;  %p743_p13 = scmp.ge.s32.totalorder %s1072_s27, 12 }
  0x1f   : > { %208 = sbr.rel (%p743_p13) target bundleno = 49 (0x31), region = 16 }
  0x26   : > { %211 = sbr.rel (!%p1176_p4) target bundleno = 49 (0x31), region = 20  ;;  %s213_s28 = sand.u32 (%p1176_p4), 1, %s1052_s22  }
  0x27   : > { %s746_s12 = sshll.u32 (%p1176_p4), %s1166_s8, 2  ;;  %s744_s13 = sshll.u32 (%p1176_p4), %s213_s28, 3 }
  0x28   : > { %s1377_s0 = sld [smem:[#allocation17_spill]] (%p1176_p4)  ;;  %s215_s14 = scalar_lea.vmem (%p1176_p4), [#allocation3], %s744_s13 }
  0x2e   : > { %s219_s9 = scalar_lea.vmem %s1377_s0, %s746_s12 }
  0x2f   : > { %v235_v0 = vld [vmem:[%s219_s9] sm:$0xf]  ;;  %v237_v1 = vld [vmem:[%s219_s9 + $0x30] sm:$0xf] }
  0x30   : > { %236 = vst [vmem:[%s215_s14] sm:$0xf] %v235_v0  ;;  %238 = vst [vmem:[%s215_s14 + $0x4] sm:$0xf] %v237_v1 }
  0x31 PF: > { %p747_p0 = scmp.ge.s32.totalorder %s1072_s27, 1  ;;  %p286_p1 = scmp.lt.s32.totalorder %s1072_s27, 13 }
  0x33   : > { %p287_p2 = pnand %p747_p0, %p286_p1 }
  0x34   : > { %s293_s8 = sand.u32 (!%p287_p2), 1, %s1048_s21   ;;  %s1217_s11 = sand.u32 (!%p287_p2), 1, %s1040_s19  }
  0x35   : > { %290 = sbr.rel (%p287_p2) target bundleno = 572 (0x23c), region = 73  ;;  %s748_s15 = sshll.u32 (!%p287_p2), %s293_s8, 3 }
  0x36   : > { %s749_s28 = sshll.u32 (!%p287_p2), %s1217_s11, 1  ;;  %p340_p3 = scmp.lt.s32.totalorder (!%p287_p2), %s1060_s24, 5 }
  0x37   : > { %s295_s7 = scalar_lea.vmem (!%p287_p2), [#allocation3], %s748_s15  ;;  %s1240_s22 = scalar_lea.vmem (!%p287_p2), [#allocation4], %s749_s28 }
  0x38   : > { %s1242_s17 = scalar_lea.vmem (!%p287_p2), [#allocation6], %s749_s28  ;;  %p755_p4 = scmp.ne.s32.totalorder (!%p287_p2), %s1056_s23, 0 }
  0x3c   : > { %s1222_s12 = scalar_select %p340_p3, %s1060_s24, 5 }
  0x3d   : > { %356 = sbr.rel (%p755_p4) target bundleno = 68 (0x44), region = 81  ;;  %vm357_vm0 = vcmask (!%p755_p4), 517120   ;;  %v1074_v2 = vmov (!%p755_p4), 0.0  }
  0x3e   : > { %s766_s13 = sshll.u32 %s1222_s12, 6  ;;  %s347_s9 = scalar_lea.vmem %s1357_s2, %s1222_s12  ;;  %358 = vst.msk [vmem:[#allocation2] sm:$0x3] (!%p755_p4), %vm357_vm0, %v1074_v2 }
  0x3f   : > { %s1232_s21 = scalar_lea.vmem %s1356_s1, %s766_s13  ;;  %s767_s6 = sshll.u32 %s1222_s12, 5 }
  0x40   : > { %s1238_s26 = scalar_lea.vmem %s1358_s3, %s767_s6 }
  0x44 PF: > { %v769_v3 = vld [vmem:[%s295_s7] sm:$0xff]   ;;  %vm364_vm1 = vcmask 523264   ;;  %vm381_vm2 = vcmask 1041409   ;;  %vm385_vm3 = vcmask 517120   ;;  %p756_p5 = scmp.ne.s32.totalorder %s1056_s23, 1 }
  0x45   : > { %v770_v4 = vunpack.c.l.bf16 %v769_v3  ;;  %v771_v5 = vunpack.c.h.bf16 %v769_v3  ;;  %v363_v18 = vld [vmem:[#allocation2] sm:$0x3]  ;;  %v394_v24 = vld [vmem:[%s1232_s21 + $0x8] sm:$0xff] (!%p756_p5)  ;;  %v395_v25 = vld [vmem:[%s1232_s21 + $0x10] sm:$0xff] (!%p756_p5)  ;;  %v1075_v26 = vmov (!%p756_p5), 0.0|0.0   ;;  %vm1076_vm4 = vmmov (!%p756_p5), 0  }
  0x46   : > { %v393_v23 = vld [vmem:[%s1232_s21] sm:$0xff] (!%p756_p5)  ;;  %816 = vmatprep.subr.bf16.mxu0 (!%p756_p5), %v1075_v26  ;;  %v396_v28 = vld [vmem:[%s1232_s21 + $0x18] sm:$0xff] (!%p756_p5)  ;;  %v1077_v29 = vmov (!%p756_p5), 0.0   ;;  %828 = vmatprep.subr.bf16.mxu1 (!%p756_p5), %v1075_v26  ;;  %v484_v32 = vld [vmem:[%s1238_s26 + $0x8] sm:$0xff] (!%p756_p5)  ;;  %vm481_vm5 = vcmask (!%p756_p5), 254976   ;;  %vm487_vm6 = vcmask (!%p756_p5), 261120  }
  0x47   : > { %v365_v6 = vsel %vm364_vm1, %v770_v4, 0.0  ;;  %v372_v7 = vsel %vm364_vm1, %v771_v5, 0.0  ;;  %v817_v27 = vpack.c.bf16 (!%p756_p5), %v394_v24, %v393_v23  ;;  %802 = vmatprep.mubr.msk.f32.mxu0 (!%p756_p5), %vm1076_vm4, %v1077_v29  ;;  %813 = vmatprep.mubr.msk.f32.mxu1 (!%p756_p5), %vm1076_vm4, %v1077_v29  ;;  %v820_v30 = vpack.c.bf16 (!%p756_p5), %v396_v28, %v395_v25  ;;  %v483_v31 = vld [vmem:[%s1238_s26] sm:$0xff] (!%p756_p5)  ;;  %v398_v34 = vld [vmem:[%s1232_s21 + $0x28] sm:$0xff] (!%p756_p5)  ;;  %v399_v37 = vld [vmem:[%s1232_s21 + $0x30] sm:$0xff] (!%p756_p5) }
  0x48   : > { %v366_v8 = vrot.slane %v365_v6, 4  ;;  %v373_v9 = vrot.slane %v372_v7, 4  ;;  %v397_v33 = vld [vmem:[%s1232_s21 + $0x20] sm:$0xff] (!%p756_p5)  ;;  %v829_v35 = vpack.c.bf16 (!%p756_p5), %v484_v32, %v483_v31  ;;  %v400_v38 = vld [vmem:[%s1232_s21 + $0x38] sm:$0xff] (!%p756_p5)  ;;  %v485_v42 = vld [vmem:[%s1238_s26 + $0x10] sm:$0xff] (!%p756_p5)  ;;  %vm561_vm7 = vcmask (!%p756_p5), 123904  }
  0x49   : > { %818 = vmatpush3.bf16.msra.mxu0 (!%p756_p5), %v817_v27  ;;  %v823_v36 = vpack.c.bf16 (!%p756_p5), %v398_v34, %v397_v33  ;;  %v826_v39 = vpack.c.bf16 (!%p756_p5), %v400_v38, %v399_v37  ;;  %v486_v43 = vld [vmem:[%s1238_s26 + $0x18] sm:$0xff] (!%p756_p5)  ;;  %v757_v45 = vld [vmem:[%s347_s9] ss:$0 sm:$0xff] (!%p756_p5) }
  0x4a   : > { %v367_v10 = vadd.f32 %v366_v8, %v365_v6  ;;  %v374_v11 = vadd.f32 %v373_v9, %v372_v7  ;;  %819 = vmatprep.subr.bf16.mxu0 (!%p756_p5), %v1075_v26  ;;  %830 = vmatpush3.bf16.msra.mxu1 (!%p756_p5), %v829_v35  ;;  %v832_v44 = vpack.c.bf16 (!%p756_p5), %v486_v43, %v485_v42 }
  0x4b   : > { %831 = vmatprep.subr.bf16.mxu1 (!%p756_p5), %v1075_v26 }
  0x4c   : > { %v368_v12 = vrot.slane %v367_v10, 2  ;;  %v375_v13 = vrot.slane %v374_v11, 2 }
  0x4d   : > { %821 = vmatpush3.bf16.msra.mxu0 (!%p756_p5), %v820_v30 }
  0x4e   : > { %v369_v14 = vadd.f32 %v368_v12, %v367_v10  ;;  %v376_v15 = vadd.f32 %v375_v13, %v374_v11  ;;  %822 = vmatprep.subr.bf16.mxu0 (!%p756_p5), %v1075_v26  ;;  %833 = vmatpush3.bf16.msra.mxu1 (!%p756_p5), %v832_v44 }
  0x50   : > { %v370_v16 = vrot.slane %v369_v14, 1  ;;  %v377_v17 = vrot.slane %v376_v15, 1 }
  0x51   : > { %390 = sbr.rel (%p756_p5) target bundleno = 524 (0x20c), region = 85  ;;  %824 = vmatpush3.bf16.msra.mxu0 (!%p756_p5), %v823_v36 }
  0x52   : > { %v371_v19 = vadd.f32 %v370_v16, %v369_v14  ;;  %v378_v20 = vadd.f32 %v377_v17, %v376_v15  ;;  %825 = vmatprep.subr.bf16.mxu0 (!%p756_p5), %v1075_v26 }
  0x54   : > { %v382_v21 = vsel %vm381_vm2, %v378_v20, %v371_v19 }
  0x55   : > { %v384_v22 = vadd.f32 %v382_v21, %v363_v18  ;;  %827 = vmatpush3.bf16.msra.mxu0 (!%p756_p5), %v826_v39 }
  0x57   : > { %386 = vst.msk [vmem:[#allocation2] sm:$0x3] %vm385_vm3, %v384_v22 }
  0x5e   : > { %v391_v40 = vld [vmem:[#allocation2] sm:$0x3] }
  0x5f   : > { %v392_v41 = vmul.f32 0.0625, %v391_v40 }
  0x61   : > { %803 = vmatmul.mubr.msk.f32.vlgmr.msra.gmra.mrb[0].mxu0 %vm364_vm1, %v392_v41 }
 0x134   : > { %v477_v46 = vpop.f32.mrb[0].mxu0 }
 0x135   : > { %v478_v47 = vadd.f32 %v757_v45, %v477_v46  ;;  %v804_v48 = vpop.f32.mrb[1].mxu0 }
 0x137   : > { %482 = vst.msk [vmem:[%s1240_s22] sm:$0x3] %vm481_vm5, %v478_v47  ;;  %814 = vmatmul.mubr.msk.f32.vlgmr.msra.gmra.mrb[0].mxu1 %vm487_vm6, %v478_v47 }
 0x20a   : > { %v557_v49 = vpop.f32.mrb[0].mxu1 }
 0x20b   : > { %562 = vst.msk [vmem:[%s1242_s17] sm:$0x3] %vm561_vm7, %v557_v49  ;;  %v815_v50 = vpop.f32.mrb[1].mxu1 }
 0x20c PF: > { %s762_s26 = sshll.u32 %s1060_s24, 5  ;;  %s582_s15 = sshll.u32 %s1240_s22, 4  ;;  %s583_s15 = int_to_ptr.vmem [resolvable:$true] %s582_s15 }
 0x20d   : > { %s1274_s7 = scalar_lea.hbm %s1359_s4, %s762_s26  ;;  %s564_s28 = scalar_lea.sflag [#allocation5], %s1217_s11 }
 0x20e   : > { %s930_s12 = scalar_lea.vmem %s583_s15, 32  ;;  %s1078_s13 = smov [#allocation4]  }
 0x20f   : > { %p931_p6 = scmp.ne.s32.totalorder %s583_s15, %s930_s12  ;;  %s934_s29 = sshll.u32 %s1078_s13, 4  ;;  %s935_s29 = int_to_ptr.vmem [resolvable:$false] %s934_s29 }
 0x210   : > { %s936_s10 = scalar_lea.vmem %s935_s29, 64  ;;  %p937_p10 = scmp.lt.s32.totalorder %s583_s15, %s935_s29 }
 0x211   : > { %p932_p7 = pnand %p931_p6, %p1191_p9  ;;  %p938_p11 = scmp.lt.s32.totalorder %s936_s10, %s930_s12 }
 0x213   : > { %p933_p8 = pneg %p932_p7  ;;  %p939_p13 = por %p938_p11, %p937_p10 }
 0x215   : > { %p940_p0 = pnand %p939_p13, %p933_p8 }
 0x217   : > { %943 = shalt.err (!%p940_p0)
}
 0x218   : > { %s944_s22 = scalar_lea.hbm %s1274_s7, 32  ;;  %s948_s21 = scalar_lea.hbm %s1359_s4, 192 }
 0x219   : > { %p945_p1 = scmp.ne.s32.totalorder %s1274_s7, %s944_s22  ;;  %p949_p4 = scmp.lt.u32.totalorder %s1274_s7, %s1359_s4 }
 0x21a   : > { %p950_p5 = scmp.lt.u32.totalorder %s948_s21, %s944_s22  ;;  %p952_p7 = scmp.lt.u32.totalorder %s944_s22, %s1274_s7 }
 0x21b   : > { %p946_p2 = pnand %p945_p1, %p1191_p9 }
 0x21c   : > { %p951_p6 = por %p950_p5, %p949_p4 }
 0x21d   : > { %p947_p3 = pneg %p946_p2 }
 0x21e   : > { %p953_p8 = por %p952_p7, %p951_p6 }
 0x220   : > { %p954_p10 = pnand %p953_p8, %p947_p3 }
 0x222   : > { %957 = shalt.err (!%p954_p10)
}
 0x223   : > { %834 = dma.vmem_to_hbm [thread:$0]  (%p1191_p9), %s583_s15, 32, %s1274_s7, %s564_s28  }
 0x224   : > { %s1300_s6 = scalar_lea.hbm %s1360_s5, %s762_s26  ;;  %s595_s12 = sshll.u32 %s1242_s17, 4  ;;  %s596_s12 = int_to_ptr.vmem [resolvable:$true] %s595_s12 }
 0x225   : > { %s569_s13 = scalar_lea.sflag [#allocation7], %s1217_s11  ;;  %s958_s29 = scalar_lea.vmem %s596_s12, 32 }
 0x226   : > { %p959_p11 = scmp.ne.s32.totalorder %s596_s12, %s958_s29  ;;  %s1079_s10 = smov [#allocation6]  }
 0x227   : > { %s962_s22 = sshll.u32 %s1079_s10, 4  ;;  %s963_s22 = int_to_ptr.vmem [resolvable:$false] %s962_s22 }
 0x228   : > { %p960_p13 = pnand %p959_p11, %p1191_p9  ;;  %s964_s9 = scalar_lea.vmem %s963_s22, 64 }
 0x229   : > { %p965_p1 = scmp.lt.s32.totalorder %s596_s12, %s963_s22  ;;  %p966_p2 = scmp.lt.s32.totalorder %s964_s9, %s958_s29 }
 0x22a   : > { %p961_p0 = pneg %p960_p13 }
 0x22b   : > { %p967_p3 = por %p966_p2, %p965_p1 }
 0x22d   : > { %p968_p4 = pnand %p967_p3, %p961_p0 }
 0x22f   : > { %971 = shalt.err (!%p968_p4)
}
 0x230   : > { %s972_s24 = scalar_lea.hbm %s1300_s6, 32  ;;  %s976_s26 = scalar_lea.hbm %s1360_s5, 192 }
 0x231   : > { %p973_p5 = scmp.ne.s32.totalorder %s1300_s6, %s972_s24  ;;  %p977_p8 = scmp.lt.u32.totalorder %s1300_s6, %s1360_s5 }
 0x232   : > { %p978_p10 = scmp.lt.u32.totalorder %s976_s26, %s972_s24  ;;  %p980_p13 = scmp.lt.u32.totalorder %s972_s24, %s1300_s6 }
 0x233   : > { %p974_p6 = pnand %p973_p5, %p1191_p9 }
 0x234   : > { %p979_p11 = por %p978_p10, %p977_p8 }
 0x235   : > { %p975_p7 = pneg %p974_p6 }
 0x236   : > { %p981_p0 = por %p980_p13, %p979_p11 }
 0x238   : > { %p982_p1 = pnand %p981_p0, %p975_p7 }
 0x23a   : > { %985 = shalt.err (!%p982_p1)
}
 0x23b   : > { %835 = dma.vmem_to_hbm [thread:$0]  (%p1191_p9), %s596_s12, 32, %s1300_s6, %s569_s13  }
 0x23c PF: > { %p845_p2 = scmp.ge.s32.totalorder %s1072_s27, 2  ;;  %s607_s28 = sand.u32 1, %s1036_s18  }
 0x23d   : > { %s608_s14 = scalar_lea.sflag [#allocation5], %s607_s28 }
 0x23e   : > { %p839_p3 = pnand %p845_p2, %p1201_p12 }
 0x240   : > { %1027 = dma.done.wait (!%p839_p3), %s608_s14, 32  }
 0x241   : > { %1029 = vsyncadd (!%p839_p3), %s608_s14, 4294967264  ;;  %s617_s21 = scalar_lea.sflag [#allocation7], %s607_s28 }
 0x242   : > { %1031 = dma.done.wait (!%p839_p3), %s617_s21, 32  }
 0x243   : > { %1033 = vsyncadd (!%p839_p3), %s617_s21, 4294967264  ;;  %s22_s27 = sadd.s32 1, %s1072_s27   ;;  %s1378_s16 = sld [smem:[#allocation15_spill]] }
 0x244   : > { %p19_p4 = scmp.ge.s32.totalorder %s22_s27, 14   ;;  %s1379_s21 = sld [smem:[#allocation10_spill]] }
 0x245   : > { %s1380_s22 = sld [smem:[#allocation16_spill]]  ;;  %s1381_s23 = sld [smem:[#allocation11_spill]] }
 0x246   : > { %s1382_s24 = sld [smem:[#allocation12_spill]]  ;;  %s1383_s25 = sld [smem:[#allocation13_spill]] }
 0x247   : > { %s1384_s26 = sld [smem:[#allocation14_spill]]  ;;  %s1385_s18 = smov %s1040_s19 }
 0x248   : > { %s1386_s19 = smov %s1044_s20  ;;  %21 = sbr.rel (!%p19_p4) target bundleno = 10 (0xa), region = 151 }
 0x249   : > { %s1387_s20 = smov %s1378_s16 }
 0x24f   :  { %622 = vsyncpa [#allocation5], 1 }
 0x250   :  { %624 = vsyncpa [#allocation5 + $0x1], 1 }
 0x251   :  { %625 = vsyncpa [#allocation7], 1 }
 0x252   :  { %627 = vsyncpa [#allocation7 + $0x1], 1 }

</bundles_post_ra>
